<compile_context>
chip_gen: v7x
topology: tpu7x:2x2x1
jax: 0.10.0
libtpu: 0.0.40
codegen_flags: <defaults>
</compile_context>

<pallas_src>
import functools
import math

import jax
import jax.numpy as jnp
from jax import lax
from jax.experimental import pallas as pl
from jax.experimental.pallas import tpu as pltpu


def _pick_batch_tile(batch, seq, target_rows=256):
    """Smallest divisor of `batch` whose packed row count bt*seq reaches
    `target_rows` (MXU-sized M); falls back to the whole batch if none does
    or if the resulting second-minor block dim would break (8,128) tiling."""
    bt = batch
    for cand in range(1, batch + 1):
        if batch % cand == 0 and cand * seq >= target_rows:
            bt = cand
            break
    if bt != batch and (bt * seq) % 8 != 0:
        bt = batch
    return bt


def _encoder_layer_kernel(
    x_ref,
    g1_ref, b1_ref,
    wqkv_ref, bqkv_ref,
    wo_ref, bo_ref,
    g2_ref, b2_ref,
    w1_ref, fb1_ref,
    w2_ref, fb2_ref,
    out_ref,
    *, nhead: int, seq_len: int, rows_per_step: int, eps: float, compute_dtype,
):
    """Fused pre-norm transformer encoder layer for `rows_per_step` batch rows.

    x_ref / out_ref blocks: (Bt*S, D).  Weights (in, out) layout, resident:
    wqkv (D, 3D), wo (D, D), w1 (D, F), w2 (F, D); biases / LN params (1, dim).
    """
    S = seq_len
    Bt = rows_per_step
    D = x_ref.shape[-1]
    P = D // nhead

    x = x_ref[...].astype(jnp.float32)                       # (Bt*S, D)

    def layer_norm(h, g, b):
        mu = jnp.mean(h, axis=-1, keepdims=True)
        var = jnp.mean((h - mu) ** 2, axis=-1, keepdims=True)
        return (h - mu) * lax.rsqrt(var + eps) * g + b

    # ---- norm1 (pre-norm), f32 vector math ---------------------------------
    xn = layer_norm(x, g1_ref[...], b1_ref[...])              # (Bt*S, D) f32

    # ---- fused QKV projection (1/sqrt(P) already folded into Q weights) ----
    qkv = (jnp.dot(xn.astype(compute_dtype), wqkv_ref[...],
                   preferred_element_type=jnp.float32)
           + bqkv_ref[...])                                   # (Bt*S, 3D) f32

    # ---- attention: loop over the packed batch rows -------------------------
    attn_rows = []
    for b in range(Bt):                                       # static unroll
        # one 2-D XLU transpose per row, then a FREE leading-dim head split
        rows_t = qkv[b * S:(b + 1) * S, :].T                  # (3D, S) f32
        t = rows_t.reshape(3 * nhead, P, S)                   # (3H, P, S)
        head_outs_t = []
        for h in range(nhead):                                # static unroll
            q_t = t[h]                                        # (P, S)
            k_t = t[nhead + h]                                # (P, S)
            v_t = t[2 * nhead + h]                            # (P, S)
            # scores: standard (S,P)@(P,S) MXU matmul (scale pre-folded)
            s = jnp.dot(q_t.T.astype(compute_dtype), k_t.astype(compute_dtype),
                        preferred_element_type=jnp.float32)   # (S, S) f32
            m = jnp.max(s, axis=-1, keepdims=True)
            e = jnp.exp(s - m)
            denom = jnp.sum(e, axis=-1, keepdims=True)
            p = e * pl.reciprocal(denom, approx=True)
            # out^T = V^T @ P^T via contract-last-dims dot_general -> (P, S)
            o_t = lax.dot_general(
                v_t.astype(compute_dtype), p.astype(compute_dtype),
                (((1,), (1,)), ((), ())),
                preferred_element_type=jnp.float32)
            head_outs_t.append(o_t)
        attn_row_t = jnp.concatenate(head_outs_t, axis=0)     # (D, S), leading concat
        attn_rows.append(attn_row_t.T)                        # (S, D)
    attn = jnp.concatenate(attn_rows, axis=0)                 # (Bt*S, D) f32

    attn_out = (jnp.dot(attn.astype(compute_dtype), wo_ref[...],
                        preferred_element_type=jnp.float32) + bo_ref[...])

    # ---- residual uses the *normed* input xn (matches the PyTorch source) ---
    x2 = layer_norm(xn + attn_out, g2_ref[...], b2_ref[...])

    # ---- feed-forward block (ReLU) ------------------------------------------
    h1 = jnp.maximum(
        jnp.dot(x2.astype(compute_dtype), w1_ref[...],
                preferred_element_type=jnp.float32) + fb1_ref[...],
        0.0)
    ff = (jnp.dot(h1.astype(compute_dtype), w2_ref[...],
                  preferred_element_type=jnp.float32) + fb2_ref[...])

    out_ref[...] = (x2 + ff).astype(out_ref.dtype)


def simple_encoder_layer(src, params, *, nhead, eps=1e-5,
                         compute_dtype=jnp.bfloat16, target_rows=256):
    """src: (B, S, D) -> (B, S, D).

    params hold weights in (in, out) layout (a PyTorch nn.Linear state_dict,
    stored (out, in), must be transposed before being passed here).
    `compute_dtype` is the MXU operand dtype (bf16 recommended; vector math
    stays f32 either way).
    """
    B, S, D = src.shape
    dff = params["w1"].shape[1]
    assert D % nhead == 0
    P = D // nhead
    f32 = jnp.float32

    Bt = _pick_batch_tile(B, S, target_rows)
    TM = Bt * S
    M = B * S
    n_steps = B // Bt

    # --- wrapper-side weight packing -----------------------------------------
    scale = 1.0 / math.sqrt(P)       # fold softmax scale into Q weight & bias
    wqkv = jnp.concatenate(
        [params["wq"] * scale, params["wk"], params["wv"]], axis=1
    ).astype(compute_dtype)                                    # (D, 3D)
    bqkv = jnp.concatenate(
        [params["bq"] * scale, params["bk"], params["bv"]], axis=1
    ).astype(f32)                                              # (1, 3D)
    wo = params["wo"].astype(compute_dtype)
    w1 = params["w1"].astype(compute_dtype)
    w2 = params["w2"].astype(compute_dtype)
    bo = params["bo"].astype(f32)
    fb1 = params["fb1"].astype(f32)
    fb2 = params["fb2"].astype(f32)
    g1 = params["g1"].astype(f32)
    b1 = params["b1"].astype(f32)
    g2 = params["g2"].astype(f32)
    b2 = params["b2"].astype(f32)

    # flatten leading dims wrapper-side (free) so the kernel sees 2-D slabs
    src2 = src.reshape(M, D)

    def whole(shape):
        nd = len(shape)
        return pl.BlockSpec(shape, lambda i: (0,) * nd)

    in_specs = [
        pl.BlockSpec((TM, D), lambda i: (i, 0)),   # packed activation rows
        whole((1, D)), whole((1, D)),              # norm1 gamma / beta
        whole((D, 3 * D)), whole((1, 3 * D)),      # fused QKV
        whole((D, D)), whole((1, D)),              # out_proj
        whole((1, D)), whole((1, D)),              # norm2 gamma / beta
        whole((D, dff)), whole((1, dff)),          # linear1
        whole((dff, D)), whole((1, D)),            # linear2
    ]

    kernel = functools.partial(
        _encoder_layer_kernel, nhead=nhead, seq_len=S, rows_per_step=Bt,
        eps=eps, compute_dtype=compute_dtype)

    flops = (2 * M * D * 3 * D                      # fused QKV
             + 4 * B * nhead * S * S * P            # scores + probs @ V
             + 2 * M * D * D                        # out projection
             + 4 * M * D * dff)                     # FFN
    transcendentals = B * nhead * S * S + 2 * M + B * nhead * S
    itemsize = jnp.dtype(compute_dtype).itemsize
    bytes_accessed = (2 * M * D * src.dtype.itemsize
                      + (wqkv.size + wo.size + w1.size + w2.size) * itemsize
                      + (bqkv.size + bo.size + fb1.size + fb2.size
                         + g1.size + b1.size + g2.size + b2.size) * 4)

    out2 = pl.pallas_call(
        kernel,
        out_shape=jax.ShapeDtypeStruct((M, D), src.dtype),
        grid=(n_steps,),
        in_specs=in_specs,
        out_specs=pl.BlockSpec((TM, D), lambda i: (i, 0)),
        compiler_params=pltpu.CompilerParams(
            dimension_semantics=("parallel",),
            vmem_limit_bytes=48 * 1024 * 1024),
        cost_estimate=pl.CostEstimate(
            flops=int(flops),
            transcendentals=int(transcendentals),
            bytes_accessed=int(bytes_accessed)),
    )(src2, g1, b1, wqkv, bqkv, wo, bo, g2, b2, w1, fb1, w2, fb2)

    return out2.reshape(B, S, D)


def _reference(src, p, nhead, eps):
    """Pure-JAX f32 reference mirroring the PyTorch forward (eval mode)."""
    def ln(x, g, b):
        mu = x.mean(-1, keepdims=True)
        var = ((x - mu) ** 2).mean(-1, keepdims=True)
        return (x - mu) / jnp.sqrt(var + eps) * g + b

    B, S, D = src.shape
    P = D // nhead
    xn = ln(src, p["g1"], p["b1"])
    q = xn @ p["wq"] + p["bq"]
    k = xn @ p["wk"] + p["bk"]
    v = xn @ p["wv"] + p["bv"]
    qh = q.reshape(B, S, nhead, P).transpose(0, 2, 1, 3)
    kh = k.reshape(B, S, nhead, P).transpose(0, 2, 1, 3)
    vh = v.reshape(B, S, nhead, P).transpose(0, 2, 1, 3)
    s = jnp.einsum("bnlp,bnsp->bnls", qh, kh) / math.sqrt(P)
    a = jax.nn.softmax(s, axis=-1)
    o = jnp.einsum("bnls,bnsp->bnlp", a, vh).transpose(0, 2, 1, 3).reshape(B, S, D)
    attn_out = o @ p["wo"] + p["bo"]
    x2 = ln(xn + attn_out, p["g2"], p["b2"])
    ff = jnp.maximum(x2 @ p["w1"] + p["fb1"], 0.0) @ p["w2"] + p["fb2"]
    return x2 + ff


if __name__ == "__main__":
    key = jax.random.PRNGKey(0)
    B, S, D, NHEAD, DFF = 2, 8, 32, 4, 64
    EPS = 1e-5

    keys = jax.random.split(key, 7)

    def linear_init(k, fin, fout):
        kw, kb = jax.random.split(k)
        lim = math.sqrt(6.0 / (fin + fout))       # xavier-uniform, (in, out) layout
        w = jax.random.uniform(kw, (fin, fout), jnp.float32, -lim, lim)
        b = jax.random.uniform(kb, (1, fout), jnp.float32, -0.05, 0.05)
        return w, b

    wq, bq = linear_init(keys[0], D, D)
    wk, bk = linear_init(keys[1], D, D)
    wv, bv = linear_init(keys[2], D, D)
    wo, bo = linear_init(keys[3], D, D)
    w1, fb1 = linear_init(keys[4], D, DFF)
    w2, fb2 = linear_init(keys[5], DFF, D)

    params = dict(
        g1=jnp.ones((1, D), jnp.float32), b1=jnp.zeros((1, D), jnp.float32),
        g2=jnp.ones((1, D), jnp.float32), b2=jnp.zeros((1, D), jnp.float32),
        wq=wq, bq=bq, wk=wk, bk=bk, wv=wv, bv=bv, wo=wo, bo=bo,
        w1=w1, fb1=fb1, w2=w2, fb2=fb2,
    )

    src = jax.random.normal(keys[6], (B, S, D), dtype=jnp.float32)
    ref = _reference(src, params, NHEAD, EPS)

    # 1) f32 MXU operands: tight numerical check of the fused kernel.
    out_f32 = simple_encoder_layer(src, params, nhead=NHEAD, eps=EPS,
                                   compute_dtype=jnp.float32)
    jax.block_until_ready(out_f32)
    assert out_f32.shape == (B, S, D) and out_f32.dtype == src.dtype
    err_f32 = float(jnp.max(jnp.abs(out_f32 - ref)))
    assert jnp.allclose(out_f32, ref, rtol=2e-2, atol=2e-2), f"f32 max_err={err_f32}"

    # 2) bf16 MXU operands (default, per perf feedback): looser check.
    out_bf16 = simple_encoder_layer(src, params, nhead=NHEAD, eps=EPS)
    jax.block_until_ready(out_bf16)
    assert out_bf16.shape == (B, S, D) and out_bf16.dtype == src.dtype
    err_bf16 = float(jnp.max(jnp.abs(out_bf16 - ref)))
    assert jnp.allclose(out_bf16, ref, rtol=5e-2, atol=5e-2), f"bf16 max_err={err_bf16}"

    print("KERNEL_OK")
</pallas_src>

<mosaic_0001>
module attributes {stable_mosaic.version = 11 : i64} {
  func.func @_encoder_layer_kernel(%arg0: i32, %arg1: memref<16x32xf32, #tpu.memory_space<vmem>>, %arg2: memref<1x32xf32, #tpu.memory_space<vmem>>, %arg3: memref<1x32xf32, #tpu.memory_space<vmem>>, %arg4: memref<32x96xf32, #tpu.memory_space<vmem>>, %arg5: memref<1x96xf32, #tpu.memory_space<vmem>>, %arg6: memref<32x32xf32, #tpu.memory_space<vmem>>, %arg7: memref<1x32xf32, #tpu.memory_space<vmem>>, %arg8: memref<1x32xf32, #tpu.memory_space<vmem>>, %arg9: memref<1x32xf32, #tpu.memory_space<vmem>>, %arg10: memref<32x64xf32, #tpu.memory_space<vmem>>, %arg11: memref<1x64xf32, #tpu.memory_space<vmem>>, %arg12: memref<64x32xf32, #tpu.memory_space<vmem>>, %arg13: memref<1x32xf32, #tpu.memory_space<vmem>>, %arg14: memref<16x32xf32, #tpu.memory_space<vmem>>) attributes {dimension_semantics = [#tpu.dimension_semantics<parallel>], iteration_bounds = array<i64: 1>, scalar_prefetch = 0 : i64, scratch_operands = 0 : i64, tpu.core_type = #tpu.core_type<tc>, window_params = [{transform_indices = @transform_0, window_bounds = array<i64: 16, 32>}, {pipeline_mode = #tpu.pipeline_mode<synchronous>, transform_indices = @transform_1, window_bounds = array<i64: 1, 32>}, {pipeline_mode = #tpu.pipeline_mode<synchronous>, transform_indices = @transform_2, window_bounds = array<i64: 1, 32>}, {pipeline_mode = #tpu.pipeline_mode<synchronous>, transform_indices = @transform_3, window_bounds = array<i64: 32, 96>}, {pipeline_mode = #tpu.pipeline_mode<synchronous>, transform_indices = @transform_4, window_bounds = array<i64: 1, 96>}, {pipeline_mode = #tpu.pipeline_mode<synchronous>, transform_indices = @transform_5, window_bounds = array<i64: 32, 32>}, {pipeline_mode = #tpu.pipeline_mode<synchronous>, transform_indices = @transform_6, window_bounds = array<i64: 1, 32>}, {pipeline_mode = #tpu.pipeline_mode<synchronous>, transform_indices = @transform_7, window_bounds = array<i64: 1, 32>}, {pipeline_mode = #tpu.pipeline_mode<synchronous>, transform_indices = @transform_8, window_bounds = array<i64: 1, 32>}, {pipeline_mode = #tpu.pipeline_mode<synchronous>, transform_indices = @transform_9, window_bounds = array<i64: 32, 64>}, {pipeline_mode = #tpu.pipeline_mode<synchronous>, transform_indices = @transform_10, window_bounds = array<i64: 1, 64>}, {pipeline_mode = #tpu.pipeline_mode<synchronous>, transform_indices = @transform_11, window_bounds = array<i64: 64, 32>}, {pipeline_mode = #tpu.pipeline_mode<synchronous>, transform_indices = @transform_12, window_bounds = array<i64: 1, 32>}, {transform_indices = @transform_13, window_bounds = array<i64: 16, 32>}]} {
    %c0 = arith.constant 0 : index
    %c0_0 = arith.constant 0 : index
    %0 = vector.load %arg1[%c0, %c0_0] : memref<16x32xf32, #tpu.memory_space<vmem>>, vector<16x32xf32>
    %c0_1 = arith.constant 0 : index
    %c0_2 = arith.constant 0 : index
    %1 = vector.load %arg2[%c0_1, %c0_2] : memref<1x32xf32, #tpu.memory_space<vmem>>, vector<1x32xf32>
    %c0_3 = arith.constant 0 : index
    %c0_4 = arith.constant 0 : index
    %2 = vector.load %arg3[%c0_3, %c0_4] : memref<1x32xf32, #tpu.memory_space<vmem>>, vector<1x32xf32>
    %cst = arith.constant dense<0.000000e+00> : vector<16xf32>
    %3 = vector.multi_reduction <add>, %0, %cst [1] : vector<16x32xf32> to vector<16xf32>
    %4 = vector.shape_cast %3 : vector<16xf32> to vector<16x1xf32>
    %cst_5 = arith.constant 3.200000e+01 : f32
    %5 = vector.broadcast %cst_5 : f32 to vector<16x1xf32>
    %6 = arith.divf %4, %5 : vector<16x1xf32>
    %7 = vector.broadcast %6 : vector<16x1xf32> to vector<16x32xf32>
    %8 = arith.subf %0, %7 : vector<16x32xf32>
    %9 = arith.mulf %8, %8 : vector<16x32xf32>
    %cst_6 = arith.constant dense<0.000000e+00> : vector<16xf32>
    %10 = vector.multi_reduction <add>, %9, %cst_6 [1] : vector<16x32xf32> to vector<16xf32>
    %11 = vector.shape_cast %10 : vector<16xf32> to vector<16x1xf32>
    %cst_7 = arith.constant 3.200000e+01 : f32
    %12 = vector.broadcast %cst_7 : f32 to vector<16x1xf32>
    %13 = arith.divf %11, %12 : vector<16x1xf32>
    %14 = vector.broadcast %6 : vector<16x1xf32> to vector<16x32xf32>
    %15 = arith.subf %0, %14 : vector<16x32xf32>
    %cst_8 = arith.constant 9.99999974E-6 : f32
    %16 = vector.broadcast %cst_8 : f32 to vector<16x1xf32>
    %17 = arith.addf %13, %16 : vector<16x1xf32>
    %18 = math.rsqrt %17 : vector<16x1xf32>
    %19 = vector.broadcast %18 : vector<16x1xf32> to vector<16x32xf32>
    %20 = arith.mulf %15, %19 : vector<16x32xf32>
    %21 = vector.broadcast %1 : vector<1x32xf32> to vector<16x32xf32>
    %22 = arith.mulf %20, %21 : vector<16x32xf32>
    %23 = vector.broadcast %2 : vector<1x32xf32> to vector<16x32xf32>
    %24 = arith.addf %22, %23 : vector<16x32xf32>
    %c0_9 = arith.constant 0 : index
    %c0_10 = arith.constant 0 : index
    %25 = vector.load %arg4[%c0_9, %c0_10] : memref<32x96xf32, #tpu.memory_space<vmem>>, vector<32x96xf32>
    %cst_11 = arith.constant dense<0.000000e+00> : vector<16x96xf32>
    %26 = tpu.matmul %24, %25, %cst_11 {dimension_numbers = #tpu.dot_dimension_numbers<[1], [0], [0], [1], [0, 0, 1, 1], [], []>} : vector<16x32xf32>, vector<32x96xf32>, vector<16x96xf32> -> vector<16x96xf32>
    %c0_12 = arith.constant 0 : index
    %c0_13 = arith.constant 0 : index
    %27 = vector.load %arg5[%c0_12, %c0_13] : memref<1x96xf32, #tpu.memory_space<vmem>>, vector<1x96xf32>
    %28 = vector.broadcast %27 : vector<1x96xf32> to vector<16x96xf32>
    %29 = arith.addf %26, %28 : vector<16x96xf32>
    %30 = vector.extract_strided_slice %29 {offsets = [0, 0], sizes = [8, 96], strides = [1, 1]} : vector<16x96xf32> to vector<8x96xf32>
    %31 = tpu.transpose %30, [1, 0] : vector<8x96xf32> -> vector<96x8xf32>
    %32 = vector.shape_cast %31 : vector<96x8xf32> to vector<12x8x8xf32>
    %33 = vector.extract_strided_slice %32 {offsets = [0, 0, 0], sizes = [1, 8, 8], strides = [1, 1, 1]} : vector<12x8x8xf32> to vector<1x8x8xf32>
    %34 = vector.shape_cast %33 : vector<1x8x8xf32> to vector<8x8xf32>
    %35 = vector.extract_strided_slice %32 {offsets = [4, 0, 0], sizes = [1, 8, 8], strides = [1, 1, 1]} : vector<12x8x8xf32> to vector<1x8x8xf32>
    %36 = vector.shape_cast %35 : vector<1x8x8xf32> to vector<8x8xf32>
    %37 = vector.extract_strided_slice %32 {offsets = [8, 0, 0], sizes = [1, 8, 8], strides = [1, 1, 1]} : vector<12x8x8xf32> to vector<1x8x8xf32>
    %38 = vector.shape_cast %37 : vector<1x8x8xf32> to vector<8x8xf32>
    %39 = tpu.transpose %34, [1, 0] : vector<8x8xf32> -> vector<8x8xf32>
    %cst_14 = arith.constant dense<0.000000e+00> : vector<8x8xf32>
    %40 = tpu.matmul %39, %36, %cst_14 {dimension_numbers = #tpu.dot_dimension_numbers<[1], [0], [0], [1], [0, 0, 1, 1], [], []>} : vector<8x8xf32>, vector<8x8xf32>, vector<8x8xf32> -> vector<8x8xf32>
    %cst_15 = arith.constant dense<0xFF800000> : vector<8xf32>
    %41 = vector.multi_reduction <maximumf>, %40, %cst_15 [1] : vector<8x8xf32> to vector<8xf32>
    %42 = vector.shape_cast %41 : vector<8xf32> to vector<8x1xf32>
    %43 = vector.broadcast %42 : vector<8x1xf32> to vector<8x8xf32>
    %44 = arith.subf %40, %43 : vector<8x8xf32>
    %45 = math.exp %44 : vector<8x8xf32>
    %cst_16 = arith.constant dense<0.000000e+00> : vector<8xf32>
    %46 = vector.multi_reduction <add>, %45, %cst_16 [1] : vector<8x8xf32> to vector<8xf32>
    %47 = vector.shape_cast %46 : vector<8xf32> to vector<8x1xf32>
    %48 = tpu.reciprocal %47 {approx = true} : vector<8x1xf32> -> vector<8x1xf32>
    %49 = vector.broadcast %48 : vector<8x1xf32> to vector<8x8xf32>
    %50 = arith.mulf %45, %49 : vector<8x8xf32>
    %cst_17 = arith.constant dense<0.000000e+00> : vector<8x8xf32>
    %51 = tpu.matmul %38, %50, %cst_17 {dimension_numbers = #tpu.dot_dimension_numbers<[1], [1], [0], [0], [0, 0, 1, 0], [], []>} : vector<8x8xf32>, vector<8x8xf32>, vector<8x8xf32> -> vector<8x8xf32>
    %52 = vector.extract_strided_slice %32 {offsets = [1, 0, 0], sizes = [1, 8, 8], strides = [1, 1, 1]} : vector<12x8x8xf32> to vector<1x8x8xf32>
    %53 = vector.shape_cast %52 : vector<1x8x8xf32> to vector<8x8xf32>
    %54 = vector.extract_strided_slice %32 {offsets = [5, 0, 0], sizes = [1, 8, 8], strides = [1, 1, 1]} : vector<12x8x8xf32> to vector<1x8x8xf32>
    %55 = vector.shape_cast %54 : vector<1x8x8xf32> to vector<8x8xf32>
    %56 = vector.extract_strided_slice %32 {offsets = [9, 0, 0], sizes = [1, 8, 8], strides = [1, 1, 1]} : vector<12x8x8xf32> to vector<1x8x8xf32>
    %57 = vector.shape_cast %56 : vector<1x8x8xf32> to vector<8x8xf32>
    %58 = tpu.transpose %53, [1, 0] : vector<8x8xf32> -> vector<8x8xf32>
    %cst_18 = arith.constant dense<0.000000e+00> : vector<8x8xf32>
    %59 = tpu.matmul %58, %55, %cst_18 {dimension_numbers = #tpu.dot_dimension_numbers<[1], [0], [0], [1], [0, 0, 1, 1], [], []>} : vector<8x8xf32>, vector<8x8xf32>, vector<8x8xf32> -> vector<8x8xf32>
    %cst_19 = arith.constant dense<0xFF800000> : vector<8xf32>
    %60 = vector.multi_reduction <maximumf>, %59, %cst_19 [1] : vector<8x8xf32> to vector<8xf32>
    %61 = vector.shape_cast %60 : vector<8xf32> to vector<8x1xf32>
    %62 = vector.broadcast %61 : vector<8x1xf32> to vector<8x8xf32>
    %63 = arith.subf %59, %62 : vector<8x8xf32>
    %64 = math.exp %63 : vector<8x8xf32>
    %cst_20 = arith.constant dense<0.000000e+00> : vector<8xf32>
    %65 = vector.multi_reduction <add>, %64, %cst_20 [1] : vector<8x8xf32> to vector<8xf32>
    %66 = vector.shape_cast %65 : vector<8xf32> to vector<8x1xf32>
    %67 = tpu.reciprocal %66 {approx = true} : vector<8x1xf32> -> vector<8x1xf32>
    %68 = vector.broadcast %67 : vector<8x1xf32> to vector<8x8xf32>
    %69 = arith.mulf %64, %68 : vector<8x8xf32>
    %cst_21 = arith.constant dense<0.000000e+00> : vector<8x8xf32>
    %70 = tpu.matmul %57, %69, %cst_21 {dimension_numbers = #tpu.dot_dimension_numbers<[1], [1], [0], [0], [0, 0, 1, 0], [], []>} : vector<8x8xf32>, vector<8x8xf32>, vector<8x8xf32> -> vector<8x8xf32>
    %71 = vector.extract_strided_slice %32 {offsets = [2, 0, 0], sizes = [1, 8, 8], strides = [1, 1, 1]} : vector<12x8x8xf32> to vector<1x8x8xf32>
    %72 = vector.shape_cast %71 : vector<1x8x8xf32> to vector<8x8xf32>
    %73 = vector.extract_strided_slice %32 {offsets = [6, 0, 0], sizes = [1, 8, 8], strides = [1, 1, 1]} : vector<12x8x8xf32> to vector<1x8x8xf32>
    %74 = vector.shape_cast %73 : vector<1x8x8xf32> to vector<8x8xf32>
    %75 = vector.extract_strided_slice %32 {offsets = [10, 0, 0], sizes = [1, 8, 8], strides = [1, 1, 1]} : vector<12x8x8xf32> to vector<1x8x8xf32>
    %76 = vector.shape_cast %75 : vector<1x8x8xf32> to vector<8x8xf32>
    %77 = tpu.transpose %72, [1, 0] : vector<8x8xf32> -> vector<8x8xf32>
    %cst_22 = arith.constant dense<0.000000e+00> : vector<8x8xf32>
    %78 = tpu.matmul %77, %74, %cst_22 {dimension_numbers = #tpu.dot_dimension_numbers<[1], [0], [0], [1], [0, 0, 1, 1], [], []>} : vector<8x8xf32>, vector<8x8xf32>, vector<8x8xf32> -> vector<8x8xf32>
    %cst_23 = arith.constant dense<0xFF800000> : vector<8xf32>
    %79 = vector.multi_reduction <maximumf>, %78, %cst_23 [1] : vector<8x8xf32> to vector<8xf32>
    %80 = vector.shape_cast %79 : vector<8xf32> to vector<8x1xf32>
    %81 = vector.broadcast %80 : vector<8x1xf32> to vector<8x8xf32>
    %82 = arith.subf %78, %81 : vector<8x8xf32>
    %83 = math.exp %82 : vector<8x8xf32>
    %cst_24 = arith.constant dense<0.000000e+00> : vector<8xf32>
    %84 = vector.multi_reduction <add>, %83, %cst_24 [1] : vector<8x8xf32> to vector<8xf32>
    %85 = vector.shape_cast %84 : vector<8xf32> to vector<8x1xf32>
    %86 = tpu.reciprocal %85 {approx = true} : vector<8x1xf32> -> vector<8x1xf32>
    %87 = vector.broadcast %86 : vector<8x1xf32> to vector<8x8xf32>
    %88 = arith.mulf %83, %87 : vector<8x8xf32>
    %cst_25 = arith.constant dense<0.000000e+00> : vector<8x8xf32>
    %89 = tpu.matmul %76, %88, %cst_25 {dimension_numbers = #tpu.dot_dimension_numbers<[1], [1], [0], [0], [0, 0, 1, 0], [], []>} : vector<8x8xf32>, vector<8x8xf32>, vector<8x8xf32> -> vector<8x8xf32>
    %90 = vector.extract_strided_slice %32 {offsets = [3, 0, 0], sizes = [1, 8, 8], strides = [1, 1, 1]} : vector<12x8x8xf32> to vector<1x8x8xf32>
    %91 = vector.shape_cast %90 : vector<1x8x8xf32> to vector<8x8xf32>
    %92 = vector.extract_strided_slice %32 {offsets = [7, 0, 0], sizes = [1, 8, 8], strides = [1, 1, 1]} : vector<12x8x8xf32> to vector<1x8x8xf32>
    %93 = vector.shape_cast %92 : vector<1x8x8xf32> to vector<8x8xf32>
    %94 = vector.extract_strided_slice %32 {offsets = [11, 0, 0], sizes = [1, 8, 8], strides = [1, 1, 1]} : vector<12x8x8xf32> to vector<1x8x8xf32>
    %95 = vector.shape_cast %94 : vector<1x8x8xf32> to vector<8x8xf32>
    %96 = tpu.transpose %91, [1, 0] : vector<8x8xf32> -> vector<8x8xf32>
    %cst_26 = arith.constant dense<0.000000e+00> : vector<8x8xf32>
    %97 = tpu.matmul %96, %93, %cst_26 {dimension_numbers = #tpu.dot_dimension_numbers<[1], [0], [0], [1], [0, 0, 1, 1], [], []>} : vector<8x8xf32>, vector<8x8xf32>, vector<8x8xf32> -> vector<8x8xf32>
    %cst_27 = arith.constant dense<0xFF800000> : vector<8xf32>
    %98 = vector.multi_reduction <maximumf>, %97, %cst_27 [1] : vector<8x8xf32> to vector<8xf32>
    %99 = vector.shape_cast %98 : vector<8xf32> to vector<8x1xf32>
    %100 = vector.broadcast %99 : vector<8x1xf32> to vector<8x8xf32>
    %101 = arith.subf %97, %100 : vector<8x8xf32>
    %102 = math.exp %101 : vector<8x8xf32>
    %cst_28 = arith.constant dense<0.000000e+00> : vector<8xf32>
    %103 = vector.multi_reduction <add>, %102, %cst_28 [1] : vector<8x8xf32> to vector<8xf32>
    %104 = vector.shape_cast %103 : vector<8xf32> to vector<8x1xf32>
    %105 = tpu.reciprocal %104 {approx = true} : vector<8x1xf32> -> vector<8x1xf32>
    %106 = vector.broadcast %105 : vector<8x1xf32> to vector<8x8xf32>
    %107 = arith.mulf %102, %106 : vector<8x8xf32>
    %cst_29 = arith.constant dense<0.000000e+00> : vector<8x8xf32>
    %108 = tpu.matmul %95, %107, %cst_29 {dimension_numbers = #tpu.dot_dimension_numbers<[1], [1], [0], [0], [0, 0, 1, 0], [], []>} : vector<8x8xf32>, vector<8x8xf32>, vector<8x8xf32> -> vector<8x8xf32>
    %109 = tpu.concatenate %51, %70, %89, %108 in 0 : vector<8x8xf32>, vector<8x8xf32>, vector<8x8xf32>, vector<8x8xf32> -> vector<32x8xf32>
    %110 = tpu.transpose %109, [1, 0] : vector<32x8xf32> -> vector<8x32xf32>
    %111 = vector.extract_strided_slice %29 {offsets = [8, 0], sizes = [8, 96], strides = [1, 1]} : vector<16x96xf32> to vector<8x96xf32>
    %112 = tpu.transpose %111, [1, 0] : vector<8x96xf32> -> vector<96x8xf32>
    %113 = vector.shape_cast %112 : vector<96x8xf32> to vector<12x8x8xf32>
    %114 = vector.extract_strided_slice %113 {offsets = [0, 0, 0], sizes = [1, 8, 8], strides = [1, 1, 1]} : vector<12x8x8xf32> to vector<1x8x8xf32>
    %115 = vector.shape_cast %114 : vector<1x8x8xf32> to vector<8x8xf32>
    %116 = vector.extract_strided_slice %113 {offsets = [4, 0, 0], sizes = [1, 8, 8], strides = [1, 1, 1]} : vector<12x8x8xf32> to vector<1x8x8xf32>
    %117 = vector.shape_cast %116 : vector<1x8x8xf32> to vector<8x8xf32>
    %118 = vector.extract_strided_slice %113 {offsets = [8, 0, 0], sizes = [1, 8, 8], strides = [1, 1, 1]} : vector<12x8x8xf32> to vector<1x8x8xf32>
    %119 = vector.shape_cast %118 : vector<1x8x8xf32> to vector<8x8xf32>
    %120 = tpu.transpose %115, [1, 0] : vector<8x8xf32> -> vector<8x8xf32>
    %cst_30 = arith.constant dense<0.000000e+00> : vector<8x8xf32>
    %121 = tpu.matmul %120, %117, %cst_30 {dimension_numbers = #tpu.dot_dimension_numbers<[1], [0], [0], [1], [0, 0, 1, 1], [], []>} : vector<8x8xf32>, vector<8x8xf32>, vector<8x8xf32> -> vector<8x8xf32>
    %cst_31 = arith.constant dense<0xFF800000> : vector<8xf32>
    %122 = vector.multi_reduction <maximumf>, %121, %cst_31 [1] : vector<8x8xf32> to vector<8xf32>
    %123 = vector.shape_cast %122 : vector<8xf32> to vector<8x1xf32>
    %124 = vector.broadcast %123 : vector<8x1xf32> to vector<8x8xf32>
    %125 = arith.subf %121, %124 : vector<8x8xf32>
    %126 = math.exp %125 : vector<8x8xf32>
    %cst_32 = arith.constant dense<0.000000e+00> : vector<8xf32>
    %127 = vector.multi_reduction <add>, %126, %cst_32 [1] : vector<8x8xf32> to vector<8xf32>
    %128 = vector.shape_cast %127 : vector<8xf32> to vector<8x1xf32>
    %129 = tpu.reciprocal %128 {approx = true} : vector<8x1xf32> -> vector<8x1xf32>
    %130 = vector.broadcast %129 : vector<8x1xf32> to vector<8x8xf32>
    %131 = arith.mulf %126, %130 : vector<8x8xf32>
    %cst_33 = arith.constant dense<0.000000e+00> : vector<8x8xf32>
    %132 = tpu.matmul %119, %131, %cst_33 {dimension_numbers = #tpu.dot_dimension_numbers<[1], [1], [0], [0], [0, 0, 1, 0], [], []>} : vector<8x8xf32>, vector<8x8xf32>, vector<8x8xf32> -> vector<8x8xf32>
    %133 = vector.extract_strided_slice %113 {offsets = [1, 0, 0], sizes = [1, 8, 8], strides = [1, 1, 1]} : vector<12x8x8xf32> to vector<1x8x8xf32>
    %134 = vector.shape_cast %133 : vector<1x8x8xf32> to vector<8x8xf32>
    %135 = vector.extract_strided_slice %113 {offsets = [5, 0, 0], sizes = [1, 8, 8], strides = [1, 1, 1]} : vector<12x8x8xf32> to vector<1x8x8xf32>
    %136 = vector.shape_cast %135 : vector<1x8x8xf32> to vector<8x8xf32>
    %137 = vector.extract_strided_slice %113 {offsets = [9, 0, 0], sizes = [1, 8, 8], strides = [1, 1, 1]} : vector<12x8x8xf32> to vector<1x8x8xf32>
    %138 = vector.shape_cast %137 : vector<1x8x8xf32> to vector<8x8xf32>
    %139 = tpu.transpose %134, [1, 0] : vector<8x8xf32> -> vector<8x8xf32>
    %cst_34 = arith.constant dense<0.000000e+00> : vector<8x8xf32>
    %140 = tpu.matmul %139, %136, %cst_34 {dimension_numbers = #tpu.dot_dimension_numbers<[1], [0], [0], [1], [0, 0, 1, 1], [], []>} : vector<8x8xf32>, vector<8x8xf32>, vector<8x8xf32> -> vector<8x8xf32>
    %cst_35 = arith.constant dense<0xFF800000> : vector<8xf32>
    %141 = vector.multi_reduction <maximumf>, %140, %cst_35 [1] : vector<8x8xf32> to vector<8xf32>
    %142 = vector.shape_cast %141 : vector<8xf32> to vector<8x1xf32>
    %143 = vector.broadcast %142 : vector<8x1xf32> to vector<8x8xf32>
    %144 = arith.subf %140, %143 : vector<8x8xf32>
    %145 = math.exp %144 : vector<8x8xf32>
    %cst_36 = arith.constant dense<0.000000e+00> : vector<8xf32>
    %146 = vector.multi_reduction <add>, %145, %cst_36 [1] : vector<8x8xf32> to vector<8xf32>
    %147 = vector.shape_cast %146 : vector<8xf32> to vector<8x1xf32>
    %148 = tpu.reciprocal %147 {approx = true} : vector<8x1xf32> -> vector<8x1xf32>
    %149 = vector.broadcast %148 : vector<8x1xf32> to vector<8x8xf32>
    %150 = arith.mulf %145, %149 : vector<8x8xf32>
    %cst_37 = arith.constant dense<0.000000e+00> : vector<8x8xf32>
    %151 = tpu.matmul %138, %150, %cst_37 {dimension_numbers = #tpu.dot_dimension_numbers<[1], [1], [0], [0], [0, 0, 1, 0], [], []>} : vector<8x8xf32>, vector<8x8xf32>, vector<8x8xf32> -> vector<8x8xf32>
    %152 = vector.extract_strided_slice %113 {offsets = [2, 0, 0], sizes = [1, 8, 8], strides = [1, 1, 1]} : vector<12x8x8xf32> to vector<1x8x8xf32>
    %153 = vector.shape_cast %152 : vector<1x8x8xf32> to vector<8x8xf32>
    %154 = vector.extract_strided_slice %113 {offsets = [6, 0, 0], sizes = [1, 8, 8], strides = [1, 1, 1]} : vector<12x8x8xf32> to vector<1x8x8xf32>
    %155 = vector.shape_cast %154 : vector<1x8x8xf32> to vector<8x8xf32>
    %156 = vector.extract_strided_slice %113 {offsets = [10, 0, 0], sizes = [1, 8, 8], strides = [1, 1, 1]} : vector<12x8x8xf32> to vector<1x8x8xf32>
    %157 = vector.shape_cast %156 : vector<1x8x8xf32> to vector<8x8xf32>
    %158 = tpu.transpose %153, [1, 0] : vector<8x8xf32> -> vector<8x8xf32>
    %cst_38 = arith.constant dense<0.000000e+00> : vector<8x8xf32>
    %159 = tpu.matmul %158, %155, %cst_38 {dimension_numbers = #tpu.dot_dimension_numbers<[1], [0], [0], [1], [0, 0, 1, 1], [], []>} : vector<8x8xf32>, vector<8x8xf32>, vector<8x8xf32> -> vector<8x8xf32>
    %cst_39 = arith.constant dense<0xFF800000> : vector<8xf32>
    %160 = vector.multi_reduction <maximumf>, %159, %cst_39 [1] : vector<8x8xf32> to vector<8xf32>
    %161 = vector.shape_cast %160 : vector<8xf32> to vector<8x1xf32>
    %162 = vector.broadcast %161 : vector<8x1xf32> to vector<8x8xf32>
    %163 = arith.subf %159, %162 : vector<8x8xf32>
    %164 = math.exp %163 : vector<8x8xf32>
    %cst_40 = arith.constant dense<0.000000e+00> : vector<8xf32>
    %165 = vector.multi_reduction <add>, %164, %cst_40 [1] : vector<8x8xf32> to vector<8xf32>
    %166 = vector.shape_cast %165 : vector<8xf32> to vector<8x1xf32>
    %167 = tpu.reciprocal %166 {approx = true} : vector<8x1xf32> -> vector<8x1xf32>
    %168 = vector.broadcast %167 : vector<8x1xf32> to vector<8x8xf32>
    %169 = arith.mulf %164, %168 : vector<8x8xf32>
    %cst_41 = arith.constant dense<0.000000e+00> : vector<8x8xf32>
    %170 = tpu.matmul %157, %169, %cst_41 {dimension_numbers = #tpu.dot_dimension_numbers<[1], [1], [0], [0], [0, 0, 1, 0], [], []>} : vector<8x8xf32>, vector<8x8xf32>, vector<8x8xf32> -> vector<8x8xf32>
    %171 = vector.extract_strided_slice %113 {offsets = [3, 0, 0], sizes = [1, 8, 8], strides = [1, 1, 1]} : vector<12x8x8xf32> to vector<1x8x8xf32>
    %172 = vector.shape_cast %171 : vector<1x8x8xf32> to vector<8x8xf32>
    %173 = vector.extract_strided_slice %113 {offsets = [7, 0, 0], sizes = [1, 8, 8], strides = [1, 1, 1]} : vector<12x8x8xf32> to vector<1x8x8xf32>
    %174 = vector.shape_cast %173 : vector<1x8x8xf32> to vector<8x8xf32>
    %175 = vector.extract_strided_slice %113 {offsets = [11, 0, 0], sizes = [1, 8, 8], strides = [1, 1, 1]} : vector<12x8x8xf32> to vector<1x8x8xf32>
    %176 = vector.shape_cast %175 : vector<1x8x8xf32> to vector<8x8xf32>
    %177 = tpu.transpose %172, [1, 0] : vector<8x8xf32> -> vector<8x8xf32>
    %cst_42 = arith.constant dense<0.000000e+00> : vector<8x8xf32>
    %178 = tpu.matmul %177, %174, %cst_42 {dimension_numbers = #tpu.dot_dimension_numbers<[1], [0], [0], [1], [0, 0, 1, 1], [], []>} : vector<8x8xf32>, vector<8x8xf32>, vector<8x8xf32> -> vector<8x8xf32>
    %cst_43 = arith.constant dense<0xFF800000> : vector<8xf32>
    %179 = vector.multi_reduction <maximumf>, %178, %cst_43 [1] : vector<8x8xf32> to vector<8xf32>
    %180 = vector.shape_cast %179 : vector<8xf32> to vector<8x1xf32>
    %181 = vector.broadcast %180 : vector<8x1xf32> to vector<8x8xf32>
    %182 = arith.subf %178, %181 : vector<8x8xf32>
    %183 = math.exp %182 : vector<8x8xf32>
    %cst_44 = arith.constant dense<0.000000e+00> : vector<8xf32>
    %184 = vector.multi_reduction <add>, %183, %cst_44 [1] : vector<8x8xf32> to vector<8xf32>
    %185 = vector.shape_cast %184 : vector<8xf32> to vector<8x1xf32>
    %186 = tpu.reciprocal %185 {approx = true} : vector<8x1xf32> -> vector<8x1xf32>
    %187 = vector.broadcast %186 : vector<8x1xf32> to vector<8x8xf32>
    %188 = arith.mulf %183, %187 : vector<8x8xf32>
    %cst_45 = arith.constant dense<0.000000e+00> : vector<8x8xf32>
    %189 = tpu.matmul %176, %188, %cst_45 {dimension_numbers = #tpu.dot_dimension_numbers<[1], [1], [0], [0], [0, 0, 1, 0], [], []>} : vector<8x8xf32>, vector<8x8xf32>, vector<8x8xf32> -> vector<8x8xf32>
    %190 = tpu.concatenate %132, %151, %170, %189 in 0 : vector<8x8xf32>, vector<8x8xf32>, vector<8x8xf32>, vector<8x8xf32> -> vector<32x8xf32>
    %191 = tpu.transpose %190, [1, 0] : vector<32x8xf32> -> vector<8x32xf32>
    %192 = tpu.concatenate %110, %191 in 0 : vector<8x32xf32>, vector<8x32xf32> -> vector<16x32xf32>
    %c0_46 = arith.constant 0 : index
    %c0_47 = arith.constant 0 : index
    %193 = vector.load %arg6[%c0_46, %c0_47] : memref<32x32xf32, #tpu.memory_space<vmem>>, vector<32x32xf32>
    %cst_48 = arith.constant dense<0.000000e+00> : vector<16x32xf32>
    %194 = tpu.matmul %192, %193, %cst_48 {dimension_numbers = #tpu.dot_dimension_numbers<[1], [0], [0], [1], [0, 0, 1, 1], [], []>} : vector<16x32xf32>, vector<32x32xf32>, vector<16x32xf32> -> vector<16x32xf32>
    %c0_49 = arith.constant 0 : index
    %c0_50 = arith.constant 0 : index
    %195 = vector.load %arg7[%c0_49, %c0_50] : memref<1x32xf32, #tpu.memory_space<vmem>>, vector<1x32xf32>
    %196 = vector.broadcast %195 : vector<1x32xf32> to vector<16x32xf32>
    %197 = arith.addf %194, %196 : vector<16x32xf32>
    %198 = arith.addf %24, %197 : vector<16x32xf32>
    %c0_51 = arith.constant 0 : index
    %c0_52 = arith.constant 0 : index
    %199 = vector.load %arg8[%c0_51, %c0_52] : memref<1x32xf32, #tpu.memory_space<vmem>>, vector<1x32xf32>
    %c0_53 = arith.constant 0 : index
    %c0_54 = arith.constant 0 : index
    %200 = vector.load %arg9[%c0_53, %c0_54] : memref<1x32xf32, #tpu.memory_space<vmem>>, vector<1x32xf32>
    %cst_55 = arith.constant dense<0.000000e+00> : vector<16xf32>
    %201 = vector.multi_reduction <add>, %198, %cst_55 [1] : vector<16x32xf32> to vector<16xf32>
    %202 = vector.shape_cast %201 : vector<16xf32> to vector<16x1xf32>
    %cst_56 = arith.constant 3.200000e+01 : f32
    %203 = vector.broadcast %cst_56 : f32 to vector<16x1xf32>
    %204 = arith.divf %202, %203 : vector<16x1xf32>
    %205 = vector.broadcast %204 : vector<16x1xf32> to vector<16x32xf32>
    %206 = arith.subf %198, %205 : vector<16x32xf32>
    %207 = arith.mulf %206, %206 : vector<16x32xf32>
    %cst_57 = arith.constant dense<0.000000e+00> : vector<16xf32>
    %208 = vector.multi_reduction <add>, %207, %cst_57 [1] : vector<16x32xf32> to vector<16xf32>
    %209 = vector.shape_cast %208 : vector<16xf32> to vector<16x1xf32>
    %cst_58 = arith.constant 3.200000e+01 : f32
    %210 = vector.broadcast %cst_58 : f32 to vector<16x1xf32>
    %211 = arith.divf %209, %210 : vector<16x1xf32>
    %212 = vector.broadcast %204 : vector<16x1xf32> to vector<16x32xf32>
    %213 = arith.subf %198, %212 : vector<16x32xf32>
    %cst_59 = arith.constant 9.99999974E-6 : f32
    %214 = vector.broadcast %cst_59 : f32 to vector<16x1xf32>
    %215 = arith.addf %211, %214 : vector<16x1xf32>
    %216 = math.rsqrt %215 : vector<16x1xf32>
    %217 = vector.broadcast %216 : vector<16x1xf32> to vector<16x32xf32>
    %218 = arith.mulf %213, %217 : vector<16x32xf32>
    %219 = vector.broadcast %199 : vector<1x32xf32> to vector<16x32xf32>
    %220 = arith.mulf %218, %219 : vector<16x32xf32>
    %221 = vector.broadcast %200 : vector<1x32xf32> to vector<16x32xf32>
    %222 = arith.addf %220, %221 : vector<16x32xf32>
    %c0_60 = arith.constant 0 : index
    %c0_61 = arith.constant 0 : index
    %223 = vector.load %arg10[%c0_60, %c0_61] : memref<32x64xf32, #tpu.memory_space<vmem>>, vector<32x64xf32>
    %cst_62 = arith.constant dense<0.000000e+00> : vector<16x64xf32>
    %224 = tpu.matmul %222, %223, %cst_62 {dimension_numbers = #tpu.dot_dimension_numbers<[1], [0], [0], [1], [0, 0, 1, 1], [], []>} : vector<16x32xf32>, vector<32x64xf32>, vector<16x64xf32> -> vector<16x64xf32>
    %c0_63 = arith.constant 0 : index
    %c0_64 = arith.constant 0 : index
    %225 = vector.load %arg11[%c0_63, %c0_64] : memref<1x64xf32, #tpu.memory_space<vmem>>, vector<1x64xf32>
    %226 = vector.broadcast %225 : vector<1x64xf32> to vector<16x64xf32>
    %227 = arith.addf %224, %226 : vector<16x64xf32>
    %cst_65 = arith.constant 0.000000e+00 : f32
    %228 = vector.broadcast %cst_65 : f32 to vector<16x64xf32>
    %229 = arith.maximumf %227, %228 : vector<16x64xf32>
    %c0_66 = arith.constant 0 : index
    %c0_67 = arith.constant 0 : index
    %230 = vector.load %arg12[%c0_66, %c0_67] : memref<64x32xf32, #tpu.memory_space<vmem>>, vector<64x32xf32>
    %cst_68 = arith.constant dense<0.000000e+00> : vector<16x32xf32>
    %231 = tpu.matmul %229, %230, %cst_68 {dimension_numbers = #tpu.dot_dimension_numbers<[1], [0], [0], [1], [0, 0, 1, 1], [], []>} : vector<16x64xf32>, vector<64x32xf32>, vector<16x32xf32> -> vector<16x32xf32>
    %c0_69 = arith.constant 0 : index
    %c0_70 = arith.constant 0 : index
    %232 = vector.load %arg13[%c0_69, %c0_70] : memref<1x32xf32, #tpu.memory_space<vmem>>, vector<1x32xf32>
    %233 = vector.broadcast %232 : vector<1x32xf32> to vector<16x32xf32>
    %234 = arith.addf %231, %233 : vector<16x32xf32>
    %235 = arith.addf %222, %234 : vector<16x32xf32>
    %c0_71 = arith.constant 0 : index
    %c0_72 = arith.constant 0 : index
    %236 = vector.load %arg14[%c0_71, %c0_72] : memref<16x32xf32, #tpu.memory_space<vmem>>, vector<16x32xf32>
    tpu.vector_store %arg14[%c0_71, %c0_72], %235 {strides = array<i32>} : memref<16x32xf32, #tpu.memory_space<vmem>>, vector<16x32xf32>,
    return
  }
  func.func @transform_0(%arg0: i32) -> (i32, i32) {
    %c0_i32 = arith.constant 0 : i32
    %c0_i32_0 = arith.constant 0 : i32
    return %arg0, %c0_i32 : i32, i32
  }
  func.func @transform_1(%arg0: i32) -> (i32, i32) {
    %c0_i32 = arith.constant 0 : i32
    %c0_i32_0 = arith.constant 0 : i32
    %c0_i32_1 = arith.constant 0 : i32
    return %c0_i32, %c0_i32_0 : i32, i32
  }
  func.func @transform_2(%arg0: i32) -> (i32, i32) {
    %c0_i32 = arith.constant 0 : i32
    %c0_i32_0 = arith.constant 0 : i32
    %c0_i32_1 = arith.constant 0 : i32
    return %c0_i32, %c0_i32_0 : i32, i32
  }
  func.func @transform_3(%arg0: i32) -> (i32, i32) {
    %c0_i32 = arith.constant 0 : i32
    %c0_i32_0 = arith.constant 0 : i32
    %c0_i32_1 = arith.constant 0 : i32
    return %c0_i32, %c0_i32_0 : i32, i32
  }
  func.func @transform_4(%arg0: i32) -> (i32, i32) {
    %c0_i32 = arith.constant 0 : i32
    %c0_i32_0 = arith.constant 0 : i32
    %c0_i32_1 = arith.constant 0 : i32
    return %c0_i32, %c0_i32_0 : i32, i32
  }
  func.func @transform_5(%arg0: i32) -> (i32, i32) {
    %c0_i32 = arith.constant 0 : i32
    %c0_i32_0 = arith.constant 0 : i32
    %c0_i32_1 = arith.constant 0 : i32
    return %c0_i32, %c0_i32_0 : i32, i32
  }
  func.func @transform_6(%arg0: i32) -> (i32, i32) {
    %c0_i32 = arith.constant 0 : i32
    %c0_i32_0 = arith.constant 0 : i32
    %c0_i32_1 = arith.constant 0 : i32
    return %c0_i32, %c0_i32_0 : i32, i32
  }
  func.func @transform_7(%arg0: i32) -> (i32, i32) {
    %c0_i32 = arith.constant 0 : i32
    %c0_i32_0 = arith.constant 0 : i32
    %c0_i32_1 = arith.constant 0 : i32
    return %c0_i32, %c0_i32_0 : i32, i32
  }
  func.func @transform_8(%arg0: i32) -> (i32, i32) {
    %c0_i32 = arith.constant 0 : i32
    %c0_i32_0 = arith.constant 0 : i32
    %c0_i32_1 = arith.constant 0 : i32
    return %c0_i32, %c0_i32_0 : i32, i32
  }
  func.func @transform_9(%arg0: i32) -> (i32, i32) {
    %c0_i32 = arith.constant 0 : i32
    %c0_i32_0 = arith.constant 0 : i32
    %c0_i32_1 = arith.constant 0 : i32
    return %c0_i32, %c0_i32_0 : i32, i32
  }
  func.func @transform_10(%arg0: i32) -> (i32, i32) {
    %c0_i32 = arith.constant 0 : i32
    %c0_i32_0 = arith.constant 0 : i32
    %c0_i32_1 = arith.constant 0 : i32
    return %c0_i32, %c0_i32_0 : i32, i32
  }
  func.func @transform_11(%arg0: i32) -> (i32, i32) {
    %c0_i32 = arith.constant 0 : i32
    %c0_i32_0 = arith.constant 0 : i32
    %c0_i32_1 = arith.constant 0 : i32
    return %c0_i32, %c0_i32_0 : i32, i32
  }
  func.func @transform_12(%arg0: i32) -> (i32, i32) {
    %c0_i32 = arith.constant 0 : i32
    %c0_i32_0 = arith.constant 0 : i32
    %c0_i32_1 = arith.constant 0 : i32
    return %c0_i32, %c0_i32_0 : i32, i32
  }
  func.func @transform_13(%arg0: i32) -> (i32, i32) {
    %c0_i32 = arith.constant 0 : i32
    %c0_i32_0 = arith.constant 0 : i32
    return %arg0, %c0_i32 : i32, i32
  }
}

</mosaic_0001>

<bundles_post_ra>
// kernel: tpu_custom_call.1
= control target key start
LH: loop header
LB: loop body
LE: loop exit
PB: predicated region body
PF: predicated region fallthrough
CT: control target
= control target key end

     0   :  { %18 = vsyncpa [#allocation3], 0  ;;  %s2906_s0 = inlined_call_operand.hbm [shape: f32[16,32], index: 0, kind: input, shape index: {}]   ;;  %s2907_s1 = inlined_call_operand.vmem [shape: f32[1,32], index: 1, kind: input, shape index: {}]   ;;  %s2908_s2 = inlined_call_operand.vmem [shape: f32[1,32], index: 2, kind: input, shape index: {}]   ;;  %s2909_s3 = inlined_call_operand.vmem [shape: f32[32,96], index: 3, kind: input, shape index: {}]   ;;  %s2910_s4 = inlined_call_operand.vmem [shape: f32[1,96], index: 4, kind: input, shape index: {}]   ;;  %s2911_s5 = inlined_call_operand.vmem [shape: f32[32,32], index: 5, kind: input, shape index: {}]   ;;  %s2912_s6 = inlined_call_operand.vmem [shape: f32[1,32], index: 6, kind: input, shape index: {}]   ;;  %s2913_s7 = inlined_call_operand.vmem [shape: f32[1,32], index: 7, kind: input, shape index: {}]   ;;  %s2914_s8 = inlined_call_operand.vmem [shape: f32[1,32], index: 8, kind: input, shape index: {}]   ;;  %s2915_s9 = inlined_call_operand.vmem [shape: f32[32,64], index: 9, kind: input, shape index: {}]   ;;  %s2916_s10 = inlined_call_operand.vmem [shape: f32[1,64], index: 10, kind: input, shape index: {}]   ;;  %s2917_s11 = inlined_call_operand.vmem [shape: f32[64,32], index: 11, kind: input, shape index: {}]   ;;  %s2918_s12 = inlined_call_operand.vmem [shape: f32[1,32], index: 12, kind: input, shape index: {}]   ;;  %s2919_s13 = inlined_call_operand.hbm [shape: f32[16,32], index: 13, kind: output, shape index: {}]  }
   0x1   :  { %19 = vsyncpa [#allocation4], 0  ;;  %s2580_s25 = smov [#allocation2]   ;;  %s2532_s29 = scalar_lea.hbm %s2906_s0, 256 }
   0x2   :  { %s25_s26 = sshll.u32 %s2580_s25, 4  ;;  %p2533_p0 = scmp.ne.s32.totalorder %s2906_s0, %s2532_s29  ;;  %s26_s26 = int_to_ptr.vmem [resolvable:$true] %s25_s26 }
   0x3   :  { %p2536_p1 = scmp.lt.u32.totalorder %s2532_s29, %s2906_s0 }
   0x5   :  { %p2538_p2 = pnand %p2536_p1, %p2533_p0 }
   0x7   :  { %2541 = shalt.err (!%p2538_p2)
}
   0x8   :  { %s2542_s17 = scalar_lea.vmem %s26_s26, 256  ;;  %p2547_p4 = scmp.lt.s32.totalorder %s26_s26, %s26_s26 }
   0x9   :  { %p2543_p3 = scmp.ne.s32.totalorder %s26_s26, %s2542_s17  ;;  %p2548_p5 = scmp.lt.s32.totalorder %s2542_s17, %s2542_s17 }
   0xb   :  { %p2549_p6 = por %p2548_p5, %p2547_p4 }
   0xd   :  { %p2550_p7 = pnand %p2549_p6, %p2543_p3 }
   0xf   :  { %2553 = shalt.err (!%p2550_p7)
}
  0x10   :  { %s2581_s18 = smov 128   ;;  %s2582_s19 = smov 8  }
  0x11   :  { %31 = dma.hbm_to_vmem [thread:$0]  %s2906_s0, 256, %s26_s26, [#allocation3], %s2581_s18, %s2581_s18, %s2582_s19  }
  0x12   :  { %2576 = dma.done.wait [#allocation3], 256  }
  0x13   :  { %2577 = vsyncadd [#allocation3], 4294967040  ;;  %vm63_vm0 = vcmask 261120   ;;  %v59_v0 = vld [vmem:[#allocation2] sm:$0xff]  ;;  %v60_v1 = vld [vmem:[#allocation2 + $0x8] sm:$0xff]  ;;  %v2583_v41 = vmov 0.0  }
  0x14   :  { %v64_v2 = vsel %vm63_vm0, %v59_v0, 0.0  ;;  %v67_v3 = vsel %vm63_vm0, %v60_v1, 0.0  ;;  %v107_v14 = vld [vmem:[%s2909_s3] sm:$0xff]  ;;  %v108_v15 = vld [vmem:[%s2909_s3 + $0x8] sm:$0xff]  ;;  %v109_v16 = vld [vmem:[%s2909_s3 + $0x10] sm:$0xff]  ;;  %2325 = vmatprep.subr.mxu1 %v2583_v41  ;;  %vm2584_vm1 = vmmov 0  }
  0x15   :  { %65 = vadd.xlane.f32.xlu0 %v64_v2  ;;  %v2446_v17 = vpack.c.bf16 %v108_v15, %v107_v14  ;;  %v110_v18 = vld [vmem:[%s2909_s3 + $0x18] sm:$0xff]  ;;  %v2214_v27 = vld [vmem:[%s2907_s1] ss:$0 sm:$0xff]  ;;  %2327 = vmatprep.mubr.msk.f32.mxu1 %vm2584_vm1, %v2583_v41  ;;  %vm263_vm2 = vcmask 64512   ;;  %vm2111_vm3 = vcmask 523264  }
  0x16   :  { %v2450_v19 = vpack.c.bf16 %v110_v18, %v109_v16  ;;  %v2215_v29 = vld [vmem:[%s2908_s2] ss:$0 sm:$0xff] }
  0x17   :  { %2447 = vmatprep.subr.bf16.mxu0 %v2446_v17  ;;  %v2216_v36 = vld [vmem:[%s2910_s4] ss:$0 sm:$0xff] }
  0x18   :  { %2449 = vmatpush3.bf16.msra.mxu0 %v2446_v17 }
  0x19   :  { %68 = vadd.xlane.f32.xlu0 %v67_v3  ;;  %2451 = vmatprep.subr.bf16.mxu0 %v2450_v19 }
  0x1c   :  { %2453 = vmatpush3.bf16.msra.mxu0 %v2450_v19 }
  0x1d   :  { %2340 = vmatprep.subr.mxu0 %v2583_v41 }
  0xa2   :  { %v66_v4 = vpop.xlane.xlu0 %65 }
  0xa3   :  { %v71_v5 = vmul.f32 0.03125, %v66_v4 }
  0xa5   :  { %v73_v6 = vsub.f32 %v59_v0, %v71_v5 }
  0xa6   :  { %v69_v7 = vpop.xlane.xlu0 %68 }
  0xa7   :  { %v72_v8 = vmul.f32 0.03125, %v69_v7  ;;  %v75_v9 = vmul.f32 %v73_v6, %v73_v6 }
  0xa9   :  { %v74_v10 = vsub.f32 %v60_v1, %v72_v8  ;;  %v77_v11 = vsel %vm63_vm0, %v75_v9, 0.0 }
  0xaa   :  { %78 = vadd.xlane.f32.xlu1 %v77_v11 }
  0xab   :  { %v76_v12 = vmul.f32 %v74_v10, %v74_v10 }
  0xad   :  { %v80_v13 = vsel %vm63_vm0, %v76_v12, 0.0 }
  0xae   :  { %81 = vadd.xlane.f32.xlu1 %v80_v13 }
 0x137   :  { %v79_v20 = vpop.xlane.xlu1 %78 }
 0x138   :  { %v83_v21 = vmul.f32 0.03125, %v79_v20 }
 0x13a   :  { %v85_v22 = vadd.f32 1e-05, %v83_v21 }
 0x13b   :  { %v82_v23 = vpop.xlane.xlu1 %81 }
 0x13c   :  { %2492 = vrsqrt.f32 %v85_v22  ;;  %v84_v24 = vmul.f32 0.03125, %v82_v23 }
 0x13e   :  { %v86_v25 = vadd.f32 1e-05, %v84_v24 }
 0x140   :  { %2494 = vrsqrt.f32 %v86_v25 }
 0x146   :  { %v2493_v26 = vpop.eup %2492 }
 0x147   :  { %v89_v28 = vmul.f32 %v2493_v26, %v73_v6 }
 0x149   :  { %v97_v30 = vmul.f32 %v2214_v27, %v89_v28 }
 0x14a   :  { %v2495_v31 = vpop.eup %2494 }
 0x14b   :  { %v90_v32 = vmul.f32 %v2495_v31, %v74_v10  ;;  %v2693_v33 = vadd.f32 %v2215_v29, %v97_v30 }
 0x14d   :  { %v98_v34 = vmul.f32 %v2214_v27, %v90_v32  ;;  %2322 = vmatprep.mubr.msk.f32.mxu0 %vm63_vm0, %v2693_v33 }
 0x14f   :  { %v2697_v35 = vadd.f32 %v2215_v29, %v98_v34 }
 0x151   :  { %2323 = vmatmul.mubr.msk.f32.vlgmr.msra.gmra.mrb[0].mxu0 %vm63_vm0, %v2697_v35 }
 0x152   :  { %2342 = vmatprep.mubr.msk.f32.mxu0 %vm2584_vm1, %v2583_v41 }
 0x224   :  { %v2324_v37 = vpop.f32.mrb[0].mxu0 }
 0x225   :  { %v196_v38 = vadd.f32 %v2324_v37, %v2216_v36  ;;  %v190_v39 = vpop.f32.mrb[1].mxu0 }
 0x226   :  { %v191_v40 = vadd.f32 %v2216_v36, %v190_v39 }
 0x228   :  { %199 = vxpose.xlu0.b32.start.end [1/1] (short) (narrow) %v191_v40, 96 }
 0x2a8   :  { %v215_v42 = vpop.trf.xlu0 }
 0x2a9   :  { %231 = vxpose.xlu1.b32.start.end [1/1] (short) (narrow) %v215_v42, 8 }
 0x2ac   :  { %v216_v43 = vpop.trf.xlu0 }
 0x2b0   :  { %v217_v44 = vpop.trf.xlu0 }
 0x2b4   :  { %v218_v45 = vpop.trf.xlu0 }
 0x2b8   :  { %v219_v46 = vpop.trf.xlu0 }
 0x2b9   :  { %2326 = vmatpush3.msra.mxu1 %v219_v46 }
 0x2ba   :  { %2330 = vmatprep.subr.mxu1 %v2583_v41 }
 0x2bc   :  { %v220_v51 = vpop.trf.xlu0 }
 0x2c0   :  { %v221_v52 = vpop.trf.xlu0 }
 0x2c4   :  { %v222_v53 = vpop.trf.xlu0 }
 0x2c8   :  { %v223_v54 = vpop.trf.xlu0 }
 0x2cc   :  { %v2715_v55 = vpop.trf.xlu0 }
 0x2d0   :  { %v2717_v56 = vpop.trf.xlu0 }
 0x2d4   :  { %v2719_v57 = vpop.trf.xlu0 }
 0x329   :  { %v247_v47 = vpop.trf.xlu1 }
 0x32a   :  { %2328 = vmatmul.mubr.msk.f32.vlgmr.msra.gmra.mrb[0].mxu1 %vm263_vm2, %v247_v47 }
 0x32b   :  { %2332 = vmatprep.mubr.msk.f32.mxu1 %vm2584_vm1, %v2583_v41 }
 0x3fd   :  { %v333_v48 = vpop.f32.mrb[0].mxu1 }
 0x3fe   :  { %v2329_v49 = vpop.f32.mrb[1].mxu1  ;;  %v337_v50 = vsel %vm263_vm2, %v333_v48, -inf }
 0x3ff   :  { %338 = vmax.xlane.f32.xlu0 %v337_v50 }
 0x42c   :  { %424 = vxpose.xlu0.b32.start.end [1/1] (short) (narrow) %v216_v43, 8 }
 0x430   :  { %808 = vxpose.xlu0.b32.start.end [1/1] (short) (narrow) %v218_v45, 8 }
 0x48c   :  { %v339_v58 = vpop.xlane.xlu0 %338 }
 0x48d   :  { %v340_v59 = vsub.f32 %v333_v48, %v339_v58 }
 0x48f   :  { %v341_v60 = vmul.f32 1.442695, %v340_v59 }
 0x491   :  { %2496 = vpow2.f32 %v341_v60 }
 0x49b   :  { %v2497_v61 = vpop.eup %2496 }
 0x49c   :  { %v343_v62 = vsel %vm263_vm2, %v2497_v61, 0.0 }
 0x49d   :  { %344 = vadd.xlane.f32.xlu1 %v343_v62 }
 0x4ac   :  { %v440_v2 = vpop.trf.xlu0 }
 0x4b0   :  { %v824_v16 = vpop.trf.xlu0 }
 0x4d0   :  { %1032 = vxpose.xlu1.b32.start.end [1/1] (short) (narrow) %v196_v38, 96 }
 0x4fd   :  { %616 = vxpose.xlu1.b32.start.end [1/1] (short) (narrow) %v217_v44, 8 }
 0x52a   :  { %v345_v63 = vpop.xlane.xlu1 %344 }
 0x52b   :  { %2498 = vrcp.f32 %v345_v63 }
 0x535   :  { %v2499_v0 = vpop.eup %2498 }
 0x536   :  { %v347_v1 = vmul.f32 %v2499_v0, %v2497_v61 }
 0x538   :  { %2331 = vmatpush3.xpose.msk.msra.mxu1 %vm263_vm2, %v347_v1 }
 0x539   :  { %2335 = vmatprep.subr.mxu1 %v2583_v41 }
 0x53b   :  { %2333 = vmatmul.mubr.msk.f32.vlgmr.msra.gmra.mrb[2].mxu1 %vm263_vm2, %v223_v54 }
 0x53c   :  { %2336 = vmatpush3.msra.mxu1 %v220_v51  ;;  %2337 = vmatprep.mubr.msk.f32.mxu1 %vm2584_vm1, %v2583_v41 }
 0x53d   :  { %2345 = vmatprep.subr.mxu1 %v2583_v41 }
 0x53f   :  { %2338 = vmatmul.mubr.msk.f32.vlgmr.msra.gmra.mrb[4].mxu1 %vm263_vm2, %v440_v2 }
 0x540   :  { %2346 = vmatpush3.msra.mxu1 %v221_v52  ;;  %2347 = vmatprep.mubr.msk.f32.mxu1 %vm2584_vm1, %v2583_v41 }
 0x541   :  { %2355 = vmatprep.subr.mxu1 %v2583_v41 }
 0x550   :  { %v1048_v3 = vpop.trf.xlu1 }
 0x551   :  { %1064 = vxpose.xlu0.b32.start.end [1/1] (short) (narrow) %v1048_v3, 8 }
 0x554   :  { %v1049_v4 = vpop.trf.xlu1 }
 0x555   :  { %1256 = vxpose.xlu1.b32.start.end [1/1] (short) (narrow) %v1049_v4, 8 }
 0x558   :  { %v1050_v5 = vpop.trf.xlu1 }
 0x559   :  { %1448 = vxpose.xlu0.b32.start.end [1/1] (short) (narrow) %v1050_v5, 8 }
 0x55c   :  { %v1051_v6 = vpop.trf.xlu1 }
 0x55d   :  { %1640 = vxpose.xlu1.b32.start.end [1/1] (short) (narrow) %v1051_v6, 8 }
 0x560   :  { %v1052_v7 = vpop.trf.xlu1 }
 0x564   :  { %v1053_v8 = vpop.trf.xlu1 }
 0x568   :  { %v1054_v9 = vpop.trf.xlu1 }
 0x56c   :  { %v1055_v10 = vpop.trf.xlu1 }
 0x570   :  { %v2732_v11 = vpop.trf.xlu1 }
 0x574   :  { %v2734_v12 = vpop.trf.xlu1 }
 0x578   :  { %v2736_v13 = vpop.trf.xlu1 }
 0x57c   :  { %v2738_v14 = vpop.trf.xlu1 }
 0x580   :  { %v632_v15 = vpop.trf.xlu1 }
 0x581   :  { %2348 = vmatmul.mubr.msk.f32.vlgmr.msra.gmra.mrb[6].mxu1 %vm263_vm2, %v632_v15 }
 0x582   :  { %2356 = vmatpush3.msra.mxu1 %v222_v53  ;;  %2357 = vmatprep.mubr.msk.f32.mxu1 %vm2584_vm1, %v2583_v41 }
 0x583   :  { %2365 = vmatprep.subr.mxu1 %v2583_v41 }
 0x585   :  { %2358 = vmatmul.mubr.msk.f32.vlgmr.msra.gmra.mrb[8].mxu1 %vm263_vm2, %v824_v16 }
 0x586   :  { %2366 = vmatpush3.msra.mxu1 %v1052_v7  ;;  %2367 = vmatprep.mubr.msk.f32.mxu1 %vm2584_vm1, %v2583_v41 }
 0x587   :  { %2375 = vmatprep.subr.mxu1 %v2583_v41 }
 0x5d1   :  { %v1080_v17 = vpop.trf.xlu0 }
 0x5d2   :  { %2368 = vmatmul.mubr.msk.f32.vlgmr.msra.gmra.mrb[10].mxu1 %vm263_vm2, %v1080_v17 }
 0x5d3   :  { %2376 = vmatpush3.msra.mxu1 %v1053_v8  ;;  %2377 = vmatprep.mubr.msk.f32.mxu1 %vm2584_vm1, %v2583_v41 }
 0x5d4   :  { %2385 = vmatprep.subr.mxu1 %v2583_v41 }
 0x5d5   :  { %v1272_v18 = vpop.trf.xlu1 }
 0x5d6   :  { %2378 = vmatmul.mubr.msk.f32.vlgmr.msra.gmra.mrb[12].mxu1 %vm263_vm2, %v1272_v18 }
 0x5d7   :  { %2386 = vmatpush3.msra.mxu1 %v1054_v9  ;;  %2387 = vmatprep.mubr.msk.f32.mxu1 %vm2584_vm1, %v2583_v41 }
 0x5d8   :  { %2395 = vmatprep.subr.mxu1 %v2583_v41 }
 0x5d9   :  { %v1464_v19 = vpop.trf.xlu0 }
 0x5da   :  { %2388 = vmatmul.mubr.msk.f32.vlgmr.msra.gmra.mrb[14].mxu1 %vm263_vm2, %v1464_v19 }
 0x5db   :  { %2396 = vmatpush3.msra.mxu1 %v1055_v10  ;;  %2397 = vmatprep.mubr.msk.f32.mxu1 %vm2584_vm1, %v2583_v41 }
 0x5dd   :  { %v1656_v20 = vpop.trf.xlu1 }
 0x5de   :  { %2398 = vmatmul.mubr.msk.f32.vlgmr.msra.gmra.mrb[16].mxu1 %vm263_vm2, %v1656_v20 }
 0x60e   :  { %v2760_v21 = vpop.f32.mrb[2].mxu1 }
 0x60f   :  { %v2334_v22 = vpop.f32.mrb[3].mxu1 }
 0x612   :  { %v525_v23 = vpop.f32.mrb[4].mxu1 }
 0x613   :  { %v529_v24 = vsel %vm263_vm2, %v525_v23, -inf  ;;  %v2339_v25 = vpop.f32.mrb[5].mxu1 }
 0x614   :  { %530 = vmax.xlane.f32.xlu0 %v529_v24 }
 0x654   :  { %v717_v26 = vpop.f32.mrb[6].mxu1 }
 0x655   :  { %v721_v27 = vsel %vm263_vm2, %v717_v26, -inf  ;;  %v2349_v28 = vpop.f32.mrb[7].mxu1 }
 0x656   :  { %722 = vmax.xlane.f32.xlu1 %v721_v27 }
 0x658   :  { %v909_v29 = vpop.f32.mrb[8].mxu1 }
 0x659   :  { %v913_v30 = vsel %vm263_vm2, %v909_v29, -inf  ;;  %v2359_v31 = vpop.f32.mrb[9].mxu1 }
 0x65a   :  { %914 = vmax.xlane.f32.xlu1 %v913_v30 }
 0x6a1   :  { %v531_v32 = vpop.xlane.xlu0 %530 }
 0x6a2   :  { %v532_v34 = vsub.f32 %v525_v23, %v531_v32 }
 0x6a4   :  { %v533_v36 = vmul.f32 1.442695, %v532_v34 }
 0x6a5   :  { %v1165_v37 = vpop.f32.mrb[10].mxu1 }
 0x6a6   :  { %2500 = vpow2.f32 %v533_v36  ;;  %v2369_v38 = vpop.f32.mrb[11].mxu1  ;;  %v1169_v39 = vsel %vm263_vm2, %v1165_v37, -inf }
 0x6a7   :  { %1170 = vmax.xlane.f32.xlu0 %v1169_v39 }
 0x6a9   :  { %v1357_v40 = vpop.f32.mrb[12].mxu1 }
 0x6aa   :  { %v2379_v42 = vpop.f32.mrb[13].mxu1  ;;  %v1361_v43 = vsel %vm263_vm2, %v1357_v40, -inf }
 0x6ab   :  { %1362 = vmax.xlane.f32.xlu1 %v1361_v43 }
 0x6ad   :  { %v1549_v44 = vpop.f32.mrb[14].mxu1 }
 0x6ae   :  { %v2389_v45 = vpop.f32.mrb[15].mxu1  ;;  %v1553_v46 = vsel %vm263_vm2, %v1549_v44, -inf }
 0x6af   :  { %1554 = vmax.xlane.f32.xlu0 %v1553_v46  ;;  %v1864_v46 = vld [vmem:[%s2911_s5] sm:$0xff] }
 0x6b0   :  { %v2501_v47 = vpop.eup %2500 }
 0x6b1   :  { %v1741_v48 = vpop.f32.mrb[16].mxu1  ;;  %v535_v49 = vsel %vm263_vm2, %v2501_v47, 0.0 }
 0x6b2   :  { %v2399_v50 = vpop.f32.mrb[17].mxu1  ;;  %v1745_v51 = vsel %vm263_vm2, %v1741_v48, -inf }
 0x6b3   :  { %1746 = vmax.xlane.f32.xlu1 %v1745_v51  ;;  %536 = vadd.xlane.f32.xlu0 %v535_v49 }
 0x6e3   :  { %v723_v52 = vpop.xlane.xlu1 %722 }
 0x6e4   :  { %v724_v53 = vsub.f32 %v717_v26, %v723_v52 }
 0x6e6   :  { %v725_v54 = vmul.f32 1.442695, %v724_v53 }
 0x6e7   :  { %v915_v58 = vpop.xlane.xlu1 %914 }
 0x6e8   :  { %2502 = vpow2.f32 %v725_v54  ;;  %v916_v59 = vsub.f32 %v909_v29, %v915_v58 }
 0x6ea   :  { %v917_v60 = vmul.f32 1.442695, %v916_v59 }
 0x6ec   :  { %2504 = vpow2.f32 %v917_v60 }
 0x6f2   :  { %v2503_v61 = vpop.eup %2502 }
 0x6f3   :  { %v727_v62 = vsel %vm263_vm2, %v2503_v61, 0.0 }
 0x6f4   :  { %728 = vadd.xlane.f32.xlu1 %v727_v62 }
 0x6f6   :  { %v2505_v63 = vpop.eup %2504 }
 0x6f7   :  { %v919_v0 = vsel %vm263_vm2, %v2505_v63, 0.0 }
 0x6f8   :  { %920 = vadd.xlane.f32.xlu0 %v919_v0 }
 0x734   :  { %v1171_v1 = vpop.xlane.xlu0 %1170 }
 0x735   :  { %v1172_v2 = vsub.f32 %v1165_v37, %v1171_v1 }
 0x737   :  { %v1173_v3 = vmul.f32 1.442695, %v1172_v2  ;;  %v2243_v2 = vld [vmem:[%s2912_s6] ss:$0 sm:$0xff] }
 0x738   :  { %v1363_v4 = vpop.xlane.xlu1 %1362 }
 0x739   :  { %2506 = vpow2.f32 %v1173_v3  ;;  %v1364_v5 = vsub.f32 %v1357_v40, %v1363_v4 }
 0x73b   :  { %v1365_v6 = vmul.f32 1.442695, %v1364_v5 }
 0x73c   :  { %v1555_v7 = vpop.xlane.xlu0 %1554 }
 0x73d   :  { %2508 = vpow2.f32 %v1365_v6  ;;  %v1556_v8 = vsub.f32 %v1549_v44, %v1555_v7 }
 0x73f   :  { %v1557_v9 = vmul.f32 1.442695, %v1556_v8 }
 0x740   :  { %v1747_v10 = vpop.xlane.xlu1 %1746  ;;  %v537_v15 = vpop.xlane.xlu0 %536 }
 0x741   :  { %2510 = vpow2.f32 %v1557_v9  ;;  %v1748_v16 = vsub.f32 %v1741_v48, %v1747_v10 }
 0x742   :  { %2512 = vrcp.f32 %v537_v15 }
 0x743   :  { %v2507_v17 = vpop.eup %2506  ;;  %v1749_v18 = vmul.f32 1.442695, %v1748_v16 }
 0x744   :  { %v1175_v19 = vsel %vm263_vm2, %v2507_v17, 0.0 }
 0x745   :  { %2514 = vpow2.f32 %v1749_v18  ;;  %1176 = vadd.xlane.f32.xlu1 %v1175_v19 }
 0x747   :  { %v2509_v20 = vpop.eup %2508 }
 0x748   :  { %v1367_v22 = vsel %vm263_vm2, %v2509_v20, 0.0 }
 0x749   :  { %1368 = vadd.xlane.f32.xlu0 %v1367_v22 }
 0x74b   :  { %v2511_v23 = vpop.eup %2510 }
 0x74c   :  { %v2513_v24 = vpop.eup %2512  ;;  %v1559_v25 = vsel %vm263_vm2, %v2511_v23, 0.0 }
 0x74d   :  { %v539_v26 = vmul.f32 %v2513_v24, %v2501_v47  ;;  %1560 = vadd.xlane.f32.xlu1 %v1559_v25  ;;  %v1865_v47 = vld [vmem:[%s2911_s5 + $0x8] sm:$0xff] }
 0x74e   :  { %v2454_v48 = vpack.c.bf16 %v1865_v47, %v1864_v46  ;;  %v2003_v25 = vld [vmem:[%s2915_s9 + $0x8] sm:$0xff]  ;;  %v2247_v47 = vld [vmem:[%s2914_s8] ss:$0 sm:$0xff] }
 0x74f   :  { %v2515_v27 = vpop.eup %2514  ;;  %2341 = vmatpush3.xpose.msk.msra.mxu0 %vm263_vm2, %v539_v26 }
 0x750   :  { %v1751_v28 = vsel %vm263_vm2, %v2515_v27, 0.0  ;;  %2350 = vmatprep.subr.mxu0 %v2583_v41 }
 0x751   :  { %1752 = vadd.xlane.f32.xlu0 %v1751_v28  ;;  %v2005_v28 = vld [vmem:[%s2915_s9 + $0x18] sm:$0xff] }
 0x752   :  { %2343 = vmatmul.mubr.msk.f32.vlgmr.msra.gmra.mrb[2].mxu0 %vm263_vm2, %v2715_v55 }
 0x753   :  { %2352 = vmatprep.mubr.msk.f32.mxu0 %vm2584_vm1, %v2583_v41 }
 0x780   :  { %1000 = vxpose.xlu1.b32.start [1/4] (short) (narrow) %v2760_v21, 8 }
 0x781   :  { %v729_v29 = vpop.xlane.xlu1 %728 }
 0x782   :  { %2516 = vrcp.f32 %v729_v29 }
 0x785   :  { %v921_v30 = vpop.xlane.xlu0 %920 }
 0x786   :  { %2518 = vrcp.f32 %v921_v30  ;;  %v2096_v30 = vld [vmem:[%s2917_s11] sm:$0xff] }
 0x78c   :  { %v2517_v31 = vpop.eup %2516 }
 0x78d   :  { %v731_v32 = vmul.f32 %v2517_v31, %v2503_v61  ;;  %v2097_v31 = vld [vmem:[%s2917_s11 + $0x8] sm:$0xff] }
 0x78f   :  { %2351 = vmatpush3.xpose.msk.msra.mxu0 %vm263_vm2, %v731_v32  ;;  %v2098_v32 = vld [vmem:[%s2917_s11 + $0x10] sm:$0xff] }
 0x790   :  { %v2519_v34 = vpop.eup %2518  ;;  %2360 = vmatprep.subr.mxu0 %v2583_v41 }
 0x791   :  { %v923_v36 = vmul.f32 %v2519_v34, %v2505_v63  ;;  %v2470_v34 = vpack.c.bf16 %v2097_v31, %v2096_v30 }
 0x792   :  { %2353 = vmatmul.mubr.msk.f32.vlgmr.msra.gmra.mrb[4].mxu0 %vm263_vm2, %v2717_v56 }
 0x793   :  { %2361 = vmatpush3.xpose.msk.msra.mxu0 %vm263_vm2, %v923_v36  ;;  %2362 = vmatprep.mubr.msk.f32.mxu0 %vm2584_vm1, %v2583_v41  ;;  %v2099_v36 = vld [vmem:[%s2917_s11 + $0x18] sm:$0xff] }
 0x794   :  { %2370 = vmatprep.subr.mxu0 %v2583_v41  ;;  %2471 = vmatprep.subr.bf16.mxu1 %v2470_v34 }
 0x795   :  { %2473 = vmatpush3.bf16.msra.mxu1 %v2470_v34 }
 0x796   :  { %2363 = vmatmul.mubr.msk.f32.vlgmr.msra.gmra.mrb[6].mxu0 %vm263_vm2, %v2719_v57 }
 0x797   :  { %2372 = vmatprep.mubr.msk.f32.mxu0 %vm2584_vm1, %v2583_v41 }
 0x7d2   :  { %v1177_v55 = vpop.xlane.xlu1 %1176 }
 0x7d3   :  { %2520 = vrcp.f32 %v1177_v55  ;;  %v2474_v55 = vpack.c.bf16 %v2099_v36, %v2098_v32 }
 0x7d5   :  { %2475 = vmatprep.subr.bf16.mxu1 %v2474_v55 }
 0x7d6   :  { %v1369_v21 = vpop.xlane.xlu0 %1368  ;;  %2477 = vmatpush3.bf16.msra.mxu1 %v2474_v55 }
 0x7d7   :  { %2522 = vrcp.f32 %v1369_v21  ;;  %v2100_v21 = vld [vmem:[%s2917_s11 + $0x20] sm:$0xff] }
 0x7da   :  { %v1561_v37 = vpop.xlane.xlu1 %1560 }
 0x7db   :  { %2524 = vrcp.f32 %v1561_v37  ;;  %v2101_v37 = vld [vmem:[%s2917_s11 + $0x28] sm:$0xff] }
 0x7dd   :  { %v2521_v56 = vpop.eup %2520 }
 0x7de   :  { %v1179_v38 = vmul.f32 %v2521_v56, %v2507_v17  ;;  %v1753_v39 = vpop.xlane.xlu0 %1752  ;;  %v2478_v56 = vpack.c.bf16 %v2101_v37, %v2100_v21 }
 0x7df   :  { %2526 = vrcp.f32 %v1753_v39 }
 0x7e0   :  { %2371 = vmatpush3.xpose.msk.msra.mxu0 %vm263_vm2, %v1179_v38  ;;  %2479 = vmatprep.subr.bf16.mxu1 %v2478_v56 }
 0x7e1   :  { %v2523_v40 = vpop.eup %2522  ;;  %2380 = vmatprep.subr.mxu0 %v2583_v41  ;;  %2481 = vmatpush3.bf16.msra.mxu1 %v2478_v56 }
 0x7e2   :  { %v1371_v42 = vmul.f32 %v2523_v40, %v2509_v20 }
 0x7e3   :  { %2373 = vmatmul.mubr.msk.f32.vlgmr.msra.gmra.mrb[8].mxu0 %vm263_vm2, %v2732_v11 }
 0x7e4   :  { %2381 = vmatpush3.xpose.msk.msra.mxu0 %vm263_vm2, %v1371_v42  ;;  %2382 = vmatprep.mubr.msk.f32.mxu0 %vm2584_vm1, %v2583_v41 }
 0x7e5   :  { %v2525_v57 = vpop.eup %2524  ;;  %2390 = vmatprep.subr.mxu0 %v2583_v41 }
 0x7e6   :  { %v1563_v43 = vmul.f32 %v2525_v57, %v2511_v23 }
 0x7e7   :  { %2383 = vmatmul.mubr.msk.f32.vlgmr.msra.gmra.mrb[10].mxu0 %vm263_vm2, %v2734_v12 }
 0x7e8   :  { %2391 = vmatpush3.xpose.msk.msra.mxu0 %vm263_vm2, %v1563_v43  ;;  %2392 = vmatprep.mubr.msk.f32.mxu0 %vm2584_vm1, %v2583_v41 }
 0x7e9   :  { %v2527_v44 = vpop.eup %2526  ;;  %2400 = vmatprep.subr.mxu0 %v2583_v41 }
 0x7ea   :  { %v1755_v11 = vmul.f32 %v2527_v44, %v2515_v27  ;;  %v2004_v27 = vld [vmem:[%s2915_s9 + $0x10] sm:$0xff] }
 0x7eb   :  { %2393 = vmatmul.mubr.msk.f32.vlgmr.msra.gmra.mrb[12].mxu0 %vm263_vm2, %v2736_v13  ;;  %v1866_v13 = vld [vmem:[%s2911_s5 + $0x10] sm:$0xff]  ;;  %v2466_v29 = vpack.c.bf16 %v2005_v28, %v2004_v27 }
 0x7ec   :  { %2401 = vmatpush3.xpose.msk.msra.mxu0 %vm263_vm2, %v1755_v11  ;;  %2402 = vmatprep.mubr.msk.f32.mxu0 %vm2584_vm1, %v2583_v41  ;;  %v1867_v41 = vld [vmem:[%s2911_s5 + $0x18] sm:$0xff]  ;;  %v2246_v11 = vld [vmem:[%s2913_s7] ss:$0 sm:$0xff] }
 0x7ed   :  { %2455 = vmatprep.subr.bf16.mxu0 %v2454_v48 }
 0x7ef   :  { %2403 = vmatmul.mubr.msk.f32.vlgmr.msra.gmra.mrb[14].mxu0 %vm263_vm2, %v2738_v14  ;;  %v2458_v14 = vpack.c.bf16 %v1867_v41, %v1866_v13 }
 0x7f0   :  { %2457 = vmatpush3.bf16.msra.mxu0 %v2454_v48 }
 0x7f1   :  { %2459 = vmatprep.subr.bf16.mxu0 %v2458_v14 }
 0x7f4   :  { %2461 = vmatpush3.bf16.msra.mxu0 %v2458_v14 }
 0x825   :  { %v612_v12 = vpop.f32.mrb[2].mxu0 }
 0x826   :  { %1001 = vxpose.xlu1.b32.cont [2/4] (short) (narrow) %v612_v12, 8  ;;  %v2344_v45 = vpop.f32.mrb[3].mxu0 }
 0x865   :  { %v804_v49 = vpop.f32.mrb[4].mxu0 }
 0x866   :  { %1002 = vxpose.xlu1.b32.cont [3/4] (short) (narrow) %v804_v49, 8  ;;  %v2354_v50 = vpop.f32.mrb[5].mxu0  ;;  %v2102_v49 = vld [vmem:[%s2917_s11 + $0x30] sm:$0xff] }
 0x867   :  { %v2103_v50 = vld [vmem:[%s2917_s11 + $0x38] sm:$0xff]  ;;  %s2585_s11 = smov [#allocation5]  }
 0x868   :  { %s2202_s30 = sshll.u32 %s2585_s11, 4  ;;  %s2203_s30 = int_to_ptr.vmem [resolvable:$true] %s2202_s30 }
 0x869   :  { %v996_v51 = vpop.f32.mrb[6].mxu0  ;;  %p2559_p9 = scmp.lt.s32.totalorder %s2203_s30, %s2203_s30 }
 0x86a   :  { %1003 = vxpose.xlu1.b32.end [4/4] (short) (narrow) %v996_v51, 8  ;;  %v2364_v52 = vpop.f32.mrb[7].mxu0  ;;  %v2482_v51 = vpack.c.bf16 %v2103_v50, %v2102_v49 }
 0x86b   :  { %v2248_v52 = vld [vmem:[%s2916_s10] ss:$0 sm:$0xff]  ;;  %s2554_s10 = scalar_lea.vmem %s2203_s30, 256 }
 0x86c   :  { %2483 = vmatprep.subr.bf16.mxu1 %v2482_v51  ;;  %p2555_p8 = scmp.ne.s32.totalorder %s2203_s30, %s2554_s10  ;;  %p2560_p10 = scmp.lt.s32.totalorder %s2554_s10, %s2554_s10 }
 0x86d   :  { %2485 = vmatpush3.bf16.msra.mxu1 %v2482_v51 }
 0x86e   :  { %p2561_p11 = por %p2560_p10, %p2559_p9 }
 0x870   :  { %p2562_p12 = pnand %p2561_p11, %p2555_p8 }
 0x8b6   :  { %v1252_v53 = vpop.f32.mrb[8].mxu0 }
 0x8b7   :  { %1832 = vxpose.xlu0.b32.start [1/4] (short) (narrow) %v1252_v53, 8  ;;  %v2374_v54 = vpop.f32.mrb[9].mxu0 }
 0x8ba   :  { %v1444_v58 = vpop.f32.mrb[10].mxu0 }
 0x8bb   :  { %1833 = vxpose.xlu0.b32.cont [2/4] (short) (narrow) %v1444_v58, 8  ;;  %v2384_v59 = vpop.f32.mrb[11].mxu0 }
 0x8be   :  { %v1636_v60 = vpop.f32.mrb[12].mxu0 }
 0x8bf   :  { %1834 = vxpose.xlu0.b32.cont [3/4] (short) (narrow) %v1636_v60, 8  ;;  %v2394_v61 = vpop.f32.mrb[13].mxu0 }
 0x8c2   :  { %v1828_v62 = vpop.f32.mrb[14].mxu0 }
 0x8c3   :  { %1835 = vxpose.xlu0.b32.end [4/4] (short) (narrow) %v1828_v62, 8  ;;  %v2404_v63 = vpop.f32.mrb[15].mxu0  ;;  %v2251_v62 = vld [vmem:[%s2918_s12] ss:$0 sm:$0xff] }
 0x8de   :  { %v1016_v0 = vpop.trf.xlu1 }
 0x8df   :  { %2413 = vmatprep.mubr.msk.f32.mxu0 %vm63_vm0, %v1016_v0 }
 0x937   :  { %v1848_v1 = vpop.trf.xlu0 }
 0x938   :  { %2414 = vmatmul.mubr.msk.f32.vlgmr.msra.gmra.mrb[16].mxu0 %vm63_vm0, %v1848_v1 }
 0xa0b   :  { %v2415_v3 = vpop.f32.mrb[16].mxu0 }
 0xa0c   :  { %v1953_v4 = vadd.f32 %v2415_v3, %v2243_v2  ;;  %v1947_v5 = vpop.f32.mrb[17].mxu0 }
 0xa0d   :  { %v1948_v6 = vadd.f32 %v2243_v2, %v1947_v5 }
 0xa0e   :  { %v1957_v7 = vadd.f32 %v1953_v4, %v2697_v35 }
 0xa0f   :  { %v1956_v8 = vadd.f32 %v1948_v6, %v2693_v33  ;;  %v2002_v33 = vld [vmem:[%s2915_s9] sm:$0xff] }
 0xa10   :  { %v1963_v9 = vsel %vm63_vm0, %v1957_v7, 0.0  ;;  %v2462_v26 = vpack.c.bf16 %v2003_v25, %v2002_v33 }
 0xa11   :  { %1964 = vadd.xlane.f32.xlu1 %v1963_v9  ;;  %v1960_v10 = vsel %vm63_vm0, %v1956_v8, 0.0 }
 0xa12   :  { %1961 = vadd.xlane.f32.xlu0 %v1960_v10  ;;  %2463 = vmatprep.subr.bf16.mxu0 %v2462_v26 }
 0xa13   :  { %2465 = vmatpush3.bf16.msra.mxu0 %v2462_v26 }
 0xa14   :  { %2467 = vmatprep.subr.bf16.mxu0 %v2466_v29 }
 0xa17   :  { %2469 = vmatpush3.bf16.msra.mxu0 %v2466_v29 }
 0xa9e   :  { %v1965_v15 = vpop.xlane.xlu1 %1964 }
 0xa9f   :  { %v1967_v16 = vmul.f32 0.03125, %v1965_v15  ;;  %v1962_v17 = vpop.xlane.xlu0 %1961 }
 0xaa0   :  { %v1966_v18 = vmul.f32 0.03125, %v1962_v17 }
 0xaa1   :  { %v1969_v19 = vsub.f32 %v1957_v7, %v1967_v16 }
 0xaa2   :  { %v1968_v20 = vsub.f32 %v1956_v8, %v1966_v18 }
 0xaa3   :  { %v1971_v22 = vmul.f32 %v1969_v19, %v1969_v19 }
 0xaa4   :  { %v1970_v23 = vmul.f32 %v1968_v20, %v1968_v20 }
 0xaa5   :  { %v1975_v24 = vsel %vm63_vm0, %v1971_v22, 0.0 }
 0xaa6   :  { %1976 = vadd.xlane.f32.xlu0 %v1975_v24  ;;  %v1972_v35 = vsel %vm63_vm0, %v1970_v23, 0.0 }
 0xaa7   :  { %1973 = vadd.xlane.f32.xlu1 %v1972_v35 }
 0xb33   :  { %v1977_v38 = vpop.xlane.xlu0 %1976 }
 0xb34   :  { %v1979_v39 = vmul.f32 0.03125, %v1977_v38  ;;  %v1974_v40 = vpop.xlane.xlu1 %1973 }
 0xb35   :  { %v1978_v42 = vmul.f32 0.03125, %v1974_v40 }
 0xb36   :  { %v1981_v57 = vadd.f32 1e-05, %v1979_v39 }
 0xb37   :  { %v1980_v43 = vadd.f32 1e-05, %v1978_v42 }
 0xb38   :  { %2528 = vrsqrt.f32 %v1981_v57 }
 0xb39   :  { %2530 = vrsqrt.f32 %v1980_v43 }
 0xb42   :  { %v2529_v44 = vpop.eup %2528 }
 0xb43   :  { %v2531_v12 = vpop.eup %2530  ;;  %v1985_v45 = vmul.f32 %v2529_v44, %v1969_v19 }
 0xb44   :  { %v1984_v46 = vmul.f32 %v2531_v12, %v1968_v20 }
 0xb45   :  { %v1993_v13 = vmul.f32 %v2246_v11, %v1985_v45 }
 0xb46   :  { %v1992_v48 = vmul.f32 %v2246_v11, %v1984_v46 }
 0xb47   :  { %v2001_v14 = vadd.f32 %v2247_v47, %v1993_v13 }
 0xb48   :  { %v2000_v41 = vadd.f32 %v2247_v47, %v1992_v48 }
 0xb4a   :  { %2424 = vmatprep.mubr.msk.f32.mxu0 %vm63_vm0, %v2000_v41 }
 0xb4b   :  { %2425 = vmatmul.mubr.msk.f32.vlgmr.msra.gmra.mrb[18].mxu0 %vm63_vm0, %v2001_v14 }
 0xc1e   :  { %v2426_v53 = vpop.f32.mrb[18].mxu0 }
 0xc1f   :  { %v2091_v54 = vadd.f32 %v2426_v53, %v2248_v52  ;;  %v2085_v58 = vpop.f32.mrb[19].mxu0 }
 0xc20   :  { %v2086_v59 = vadd.f32 %v2248_v52, %v2085_v58 }
 0xc21   :  { %v2095_v61 = vmax.f32 %v2091_v54, 0.0 }
 0xc22   :  { %v2094_v60 = vmax.f32 %v2086_v59, 0.0 }
 0xc24   :  { %2443 = vmatprep.mubr.msk.f32.mxu1 %vm2111_vm3, %v2094_v60 }
 0xc25   :  { %2444 = vmatmul.mubr.msk.f32.vlgmr.msra.gmra.mrb[18].mxu1 %vm2111_vm3, %v2095_v61 }
 0xcf8   :  { %v2445_v63 = vpop.f32.mrb[18].mxu1 }
 0xcf9   :  { %v2190_v0 = vadd.f32 %v2445_v63, %v2251_v62  ;;  %v2184_v1 = vpop.f32.mrb[19].mxu1 }
 0xcfa   :  { %v2185_v2 = vadd.f32 %v2251_v62, %v2184_v1 }
 0xcfb   :  { %v2194_v3 = vadd.f32 %v2190_v0, %v2001_v14 }
 0xcfc   :  { %v2193_v4 = vadd.f32 %v2185_v2, %v2000_v41 }
 0xcfd   :  { %2196 = vst.msk [vmem:[#allocation5 + $0x8] sm:$0xff] %vm63_vm0, %v2194_v3 }
 0xcfe   :  { %2195 = vst.msk [vmem:[#allocation5] sm:$0xff] %vm63_vm0, %v2193_v4 }
 0xcff   :  { %2565 = shalt.err (!%p2562_p12)
}
 0xd00   :  { %s2566_s14 = scalar_lea.hbm %s2919_s13, 256 }
 0xd01   :  { %p2567_p13 = scmp.ne.s32.totalorder %s2919_s13, %s2566_s14  ;;  %p2570_p0 = scmp.lt.u32.totalorder %s2566_s14, %s2919_s13 }
 0xd03   :  { %p2572_p1 = pnand %p2570_p0, %p2567_p13 }
 0xd05   :  { %2575 = shalt.err (!%p2572_p1)
}
 0xd06   :  { %2208 = dma.vmem_to_hbm [thread:$0]  %s2203_s30, 256, %s2919_s13, [#allocation4], %s2581_s18, %s2581_s18, %s2582_s19  }
 0xd07   :  { %2578 = dma.done.wait [#allocation4], 256  }
 0xd08   :  { %2579 = vsyncadd [#allocation4], 4294967040 }
 0xd09   :  { %2212 = vsyncpa [#allocation3], 1 }
 0xd0a   :  { %2213 = vsyncpa [#allocation4], 1 }

</bundles_post_ra>
